<compile_context>
chip_gen: v5e
topology: v5e:2x2
jax: 0.10.0
libtpu: 0.0.40
codegen_flags: <defaults>
</compile_context>

<pallas_src>
import functools

import jax
import jax.numpy as jnp
from jax.experimental import pallas as pl
from jax.experimental.pallas import tpu as pltpu


def _round_up(x, m):
    return ((x + m - 1) // m) * m


def _policy_kernel(state_ref, w_ref, b_ref, out_ref, *,
                   state_dim, action_dim, plane):
    """Fused MLP trunk + (action|value) heads.

    state_ref : (TB, state_dim) f32
    w_ref     : (3, P, P) zero-padded square weight planes
                  [0] = W1  (state_dim x nn_size, zero-padded)
                  [1] = W2  (nn_size   x nn_size, zero-padded)
                  [2] = [Wa | Wv] (nn_size x action_dim+1, zero-padded)
    b_ref     : (3, P) zero-padded biases [b1 | b2 | ba,bv]
    out_ref   : (TB, action_dim + 1) f32  ->  [softmax(logits) | value]
    """
    a1 = action_dim + 1
    x = state_ref[...]
    tb = x.shape[0]

    # Zero-extend the state tile to P lanes in registers so we can dot against
    # the full (P, P) plane (extra K is free on the MXU, no VMEM relayouts).
    if plane > state_dim:
        x = jnp.concatenate(
            [x, jnp.zeros((tb, plane - state_dim), jnp.float32)], axis=-1)

    w1 = w_ref[0]
    w2 = w_ref[1]
    wh = w_ref[2]
    b1 = b_ref[0:1, :]
    b2 = b_ref[1:2, :]
    bh = b_ref[2:3, :]

    # Trunk MLP: Linear -> ReLU -> Linear -> ReLU (f32 accumulation on MXU).
    # Zero-padded rows/cols of the planes keep the padded lanes exactly zero.
    h1 = jnp.maximum(jnp.dot(x, w1, preferred_element_type=jnp.float32) + b1, 0.0)
    h2 = jnp.maximum(jnp.dot(h1, w2, preferred_element_type=jnp.float32) + b2, 0.0)

    # Fused heads: one matmul produces [action logits | value | zero pad].
    heads = jnp.dot(h2, wh, preferred_element_type=jnp.float32) + bh

    logits = heads[:, :action_dim]
    value = heads[:, action_dim:a1]

    # Numerically-stable softmax; reciprocal on the EUP + one Newton step.
    # NOTE: on the partial last grid block the padded tail rows hold garbage;
    # they stay within their own rows and the masked writeback drops them.
    logits = logits - jnp.max(logits, axis=-1, keepdims=True)
    e = jnp.exp(logits)
    denom = jnp.sum(e, axis=-1, keepdims=True)
    r = pl.reciprocal(denom, approx=True)
    r = r * (2.0 - denom * r)

    # Single full-tile store of [softmax | value].
    out_ref[...] = jnp.concatenate([e * r, value], axis=-1)


def make_forward(state_dim, nn_size, action_dim, *, batch_tile=4096):
    """Returns a jitted forward(state, hidden, params) for the policy module.

    batch_tile: rows per grid step on the batch-tiled path. 4096 keeps the
    double-buffered tiles + f32 intermediates well under v5e's 16 MiB scoped
    VMEM while amortizing the ~0.35 us/step grid overhead 16x vs 256.
    """
    a1 = action_dim + 1
    plane = _round_up(max(state_dim, nn_size, a1), 8)
    kernel = functools.partial(
        _policy_kernel,
        state_dim=state_dim, action_dim=action_dim, plane=plane)

    slab_bytes = 4 * (3 * plane * plane + 3 * plane)

    def _cost(batch):
        return pl.CostEstimate(
            flops=2 * batch * (state_dim * nn_size + nn_size * nn_size
                               + nn_size * a1),
            transcendentals=batch * a1,
            bytes_accessed=4 * batch * (state_dim + a1) + slab_bytes)

    @jax.jit
    def forward(state, hidden, params):
        w_slab, b_slab, logstd = params["w_slab"], params["b_slab"], params["logstd"]
        batch = state.shape[0]

        if batch <= batch_tile:
            # Small batch: gridless call, single invocation, no pipeline
            # machinery; all operands fully resident in VMEM.
            out = pl.pallas_call(
                kernel,
                out_shape=jax.ShapeDtypeStruct((batch, a1), jnp.float32),
                in_specs=[pl.BlockSpec(memory_space=pltpu.MemorySpace.VMEM)] * 3,
                out_specs=pl.BlockSpec(memory_space=pltpu.MemorySpace.VMEM),
                cost_estimate=_cost(batch),
            )(state, w_slab, b_slab)
        else:
            # Large batch: tile the batch axis ("parallel" so both v7x
            # TensorCores split the grid). No wrapper-side pad/slice: Pallas
            # masks the partial last block. Weights/biases map to the same
            # block every step and stay resident in VMEM.
            out = pl.pallas_call(
                kernel,
                grid=(pl.cdiv(batch, batch_tile),),
                out_shape=jax.ShapeDtypeStruct((batch, a1), jnp.float32),
                in_specs=[
                    pl.BlockSpec((batch_tile, state_dim), lambda i: (i, 0)),
                    pl.BlockSpec(w_slab.shape, lambda i: (0, 0, 0)),
                    pl.BlockSpec(b_slab.shape, lambda i: (0, 0)),
                ],
                out_specs=pl.BlockSpec((batch_tile, a1), lambda i: (i, 0)),
                compiler_params=pltpu.CompilerParams(
                    dimension_semantics=("parallel",)),
                cost_estimate=_cost(batch),
            )(state, w_slab, b_slab)

        mean = out[:, :action_dim]
        value = out[:, action_dim]
        return (mean, logstd), hidden, value

    return forward


def init_params(key, state_dim, nn_size, action_dim):
    """PyTorch-style nn.Linear init. Weights stored as (in, out) — transpose of
    torch's (out, in) — zero-padded to square (P, P) planes and packed into one
    weight slab + one bias slab (3 kernel inputs, no in-kernel slicing).
    Returns (packed_params, raw_params)."""
    ks = jax.random.split(key, 9)

    def lin(kw, kb, fan_in, fan_out):
        bound = float(fan_in) ** -0.5
        w = jax.random.uniform(kw, (fan_in, fan_out), jnp.float32, -bound, bound)
        b = jax.random.uniform(kb, (fan_out,), jnp.float32, -bound, bound)
        return w, b

    w1, b1 = lin(ks[0], ks[1], state_dim, nn_size)
    w2, b2 = lin(ks[2], ks[3], nn_size, nn_size)
    wa, ba = lin(ks[4], ks[5], nn_size, action_dim)
    wv, bv = lin(ks[6], ks[7], nn_size, 1)

    # logstd = A^T A with A ~ N(0, 1), shape (action_dim, action_dim)
    a = jax.random.normal(ks[8], (action_dim, action_dim), jnp.float32)
    logstd = a.T @ a

    a1 = action_dim + 1
    plane = _round_up(max(state_dim, nn_size, a1), 8)

    def pad2(m):
        return jnp.pad(m, ((0, plane - m.shape[0]), (0, plane - m.shape[1])))

    def pad1(v):
        return jnp.pad(v, (0, plane - v.shape[0]))

    w_heads = jnp.concatenate([wa, wv], axis=1)          # (H, A+1) fused heads
    b_heads = jnp.concatenate([ba, bv], axis=0)          # (A+1,)

    w_slab = jnp.stack([pad2(w1), pad2(w2), pad2(w_heads)], axis=0)   # (3, P, P)
    b_slab = jnp.stack([pad1(b1), pad1(b2), pad1(b_heads)], axis=0)   # (3, P)

    params = {"w_slab": w_slab, "b_slab": b_slab, "logstd": logstd}
    raw = {"w1": w1, "b1": b1, "w2": w2, "b2": b2,
           "wa": wa, "ba": ba, "wv": wv, "bv": bv, "logstd": logstd}
    return params, raw


def _reference(state, hidden, raw):
    x = jnp.maximum(state @ raw["w1"] + raw["b1"], 0.0)
    x = jnp.maximum(x @ raw["w2"] + raw["b2"], 0.0)
    mean = jax.nn.softmax(x @ raw["wa"] + raw["ba"], axis=-1)
    value = (x @ raw["wv"] + raw["bv"]).squeeze(-1)
    return (mean, raw["logstd"]), hidden, value


if __name__ == "__main__":
    # Small shapes consistent with the module.
    batch, state_dim, nn_size, action_dim, hidden_size = 8, 16, 32, 8, 20

    key = jax.random.PRNGKey(0)
    k_params, k_state, k_hidden, k_big = jax.random.split(key, 4)

    params, raw = init_params(k_params, state_dim, nn_size, action_dim)
    forward = make_forward(state_dim, nn_size, action_dim)

    state = jax.random.normal(k_state, (batch, state_dim), jnp.float32)
    hidden = jax.random.normal(k_hidden, (batch, hidden_size), jnp.float32)

    (mean, logstd), hidden_out, value = forward(state, hidden, params)
    jax.block_until_ready((mean, logstd, hidden_out, value))

    # Correctness check against a pure-JAX reference (gridless path).
    (mean_r, _), _, value_r = _reference(state, hidden, raw)
    assert mean.shape == (batch, action_dim)
    assert value.shape == (batch,)
    assert logstd.shape == (action_dim, action_dim)
    assert jnp.allclose(mean, mean_r, atol=1e-5, rtol=1e-5)
    assert jnp.allclose(value, value_r, atol=1e-5, rtol=1e-5)
    assert jnp.allclose(hidden_out, hidden)

    # Exercise the batch-tiled ("parallel" grid) path with a larger rollout
    # batch that is NOT a multiple of batch_tile, so the partial-last-block
    # masking (no wrapper pad/slice) is also checked.
    big_batch = 10000
    state_big = jax.random.normal(k_big, (big_batch, state_dim), jnp.float32)
    hidden_big = jnp.zeros((big_batch, hidden_size), jnp.float32)
    (mean_b, _), _, value_b = forward(state_big, hidden_big, params)
    jax.block_until_ready((mean_b, value_b))
    (mean_br, _), _, value_br = _reference(state_big, hidden_big, raw)
    assert mean_b.shape == (big_batch, action_dim)
    assert value_b.shape == (big_batch,)
    assert jnp.allclose(mean_b, mean_br, atol=1e-4, rtol=1e-4)
    assert jnp.allclose(value_b, value_br, atol=1e-4, rtol=1e-4)

    print("KERNEL_OK")
</pallas_src>

<mosaic_0001>
module attributes {stable_mosaic.version = 11 : i64} {
  func.func @_policy_kernel(%arg0: memref<8x16xf32, #tpu.memory_space<vmem>>, %arg1: memref<3x32x32xf32, #tpu.memory_space<vmem>>, %arg2: memref<3x32xf32, #tpu.memory_space<vmem>>, %arg3: memref<8x9xf32, #tpu.memory_space<vmem>>) attributes {dimension_semantics = [], scalar_prefetch = 0 : i64, scratch_operands = 0 : i64, tpu.core_type = #tpu.core_type<tc>} {
    %c0 = arith.constant 0 : index
    %c0_0 = arith.constant 0 : index
    %0 = vector.load %arg0[%c0, %c0_0] : memref<8x16xf32, #tpu.memory_space<vmem>>, vector<8x16xf32>
    %cst = arith.constant 0.000000e+00 : f32
    %1 = vector.broadcast %cst : f32 to vector<8x16xf32>
    %2 = tpu.concatenate %0, %1 in 1 : vector<8x16xf32>, vector<8x16xf32> -> vector<8x32xf32>
    %c0_1 = arith.constant 0 : index
    %c0_2 = arith.constant 0 : index
    %c0_3 = arith.constant 0 : index
    %3 = vector.load %arg1[%c0_1, %c0_2, %c0_3] : memref<3x32x32xf32, #tpu.memory_space<vmem>>, vector<1x32x32xf32>
    %4 = vector.shape_cast %3 : vector<1x32x32xf32> to vector<32x32xf32>
    %c1 = arith.constant 1 : index
    %c0_4 = arith.constant 0 : index
    %c0_5 = arith.constant 0 : index
    %5 = vector.load %arg1[%c1, %c0_4, %c0_5] : memref<3x32x32xf32, #tpu.memory_space<vmem>>, vector<1x32x32xf32>
    %6 = vector.shape_cast %5 : vector<1x32x32xf32> to vector<32x32xf32>
    %c2 = arith.constant 2 : index
    %c0_6 = arith.constant 0 : index
    %c0_7 = arith.constant 0 : index
    %7 = vector.load %arg1[%c2, %c0_6, %c0_7] : memref<3x32x32xf32, #tpu.memory_space<vmem>>, vector<1x32x32xf32>
    %8 = vector.shape_cast %7 : vector<1x32x32xf32> to vector<32x32xf32>
    %c0_8 = arith.constant 0 : index
    %c0_9 = arith.constant 0 : index
    %9 = vector.load %arg2[%c0_8, %c0_9] : memref<3x32xf32, #tpu.memory_space<vmem>>, vector<1x32xf32>
    %c1_10 = arith.constant 1 : index
    %c0_11 = arith.constant 0 : index
    %10 = vector.load %arg2[%c1_10, %c0_11] : memref<3x32xf32, #tpu.memory_space<vmem>>, vector<1x32xf32>
    %c2_12 = arith.constant 2 : index
    %c0_13 = arith.constant 0 : index
    %11 = vector.load %arg2[%c2_12, %c0_13] : memref<3x32xf32, #tpu.memory_space<vmem>>, vector<1x32xf32>
    %cst_14 = arith.constant dense<0.000000e+00> : vector<8x32xf32>
    %12 = tpu.matmul %2, %4, %cst_14 {dimension_numbers = #tpu.dot_dimension_numbers<[1], [0], [0], [1], [0, 0, 1, 1], [], []>} : vector<8x32xf32>, vector<32x32xf32>, vector<8x32xf32> -> vector<8x32xf32>
    %13 = vector.broadcast %9 : vector<1x32xf32> to vector<8x32xf32>
    %14 = arith.addf %12, %13 : vector<8x32xf32>
    %cst_15 = arith.constant 0.000000e+00 : f32
    %15 = vector.broadcast %cst_15 : f32 to vector<8x32xf32>
    %16 = arith.maximumf %14, %15 : vector<8x32xf32>
    %cst_16 = arith.constant dense<0.000000e+00> : vector<8x32xf32>
    %17 = tpu.matmul %16, %6, %cst_16 {dimension_numbers = #tpu.dot_dimension_numbers<[1], [0], [0], [1], [0, 0, 1, 1], [], []>} : vector<8x32xf32>, vector<32x32xf32>, vector<8x32xf32> -> vector<8x32xf32>
    %18 = vector.broadcast %10 : vector<1x32xf32> to vector<8x32xf32>
    %19 = arith.addf %17, %18 : vector<8x32xf32>
    %cst_17 = arith.constant 0.000000e+00 : f32
    %20 = vector.broadcast %cst_17 : f32 to vector<8x32xf32>
    %21 = arith.maximumf %19, %20 : vector<8x32xf32>
    %cst_18 = arith.constant dense<0.000000e+00> : vector<8x32xf32>
    %22 = tpu.matmul %21, %8, %cst_18 {dimension_numbers = #tpu.dot_dimension_numbers<[1], [0], [0], [1], [0, 0, 1, 1], [], []>} : vector<8x32xf32>, vector<32x32xf32>, vector<8x32xf32> -> vector<8x32xf32>
    %23 = vector.broadcast %11 : vector<1x32xf32> to vector<8x32xf32>
    %24 = arith.addf %22, %23 : vector<8x32xf32>
    %25 = vector.extract_strided_slice %24 {offsets = [0, 0], sizes = [8, 8], strides = [1, 1]} : vector<8x32xf32> to vector<8x8xf32>
    %26 = vector.extract_strided_slice %24 {offsets = [0, 8], sizes = [8, 1], strides = [1, 1]} : vector<8x32xf32> to vector<8x1xf32>
    %cst_19 = arith.constant dense<0xFF800000> : vector<8xf32>
    %27 = vector.multi_reduction <maximumf>, %25, %cst_19 [1] : vector<8x8xf32> to vector<8xf32>
    %28 = vector.shape_cast %27 : vector<8xf32> to vector<8x1xf32>
    %29 = vector.broadcast %28 : vector<8x1xf32> to vector<8x8xf32>
    %30 = arith.subf %25, %29 : vector<8x8xf32>
    %31 = math.exp %30 : vector<8x8xf32>
    %cst_20 = arith.constant dense<0.000000e+00> : vector<8xf32>
    %32 = vector.multi_reduction <add>, %31, %cst_20 [1] : vector<8x8xf32> to vector<8xf32>
    %33 = vector.shape_cast %32 : vector<8xf32> to vector<8x1xf32>
    %34 = tpu.reciprocal %33 {approx = true} : vector<8x1xf32> -> vector<8x1xf32>
    %35 = arith.mulf %33, %34 : vector<8x1xf32>
    %cst_21 = arith.constant 2.000000e+00 : f32
    %36 = vector.broadcast %cst_21 : f32 to vector<8x1xf32>
    %37 = arith.subf %36, %35 : vector<8x1xf32>
    %38 = arith.mulf %34, %37 : vector<8x1xf32>
    %39 = vector.broadcast %38 : vector<8x1xf32> to vector<8x8xf32>
    %40 = arith.mulf %31, %39 : vector<8x8xf32>
    %41 = tpu.concatenate %40, %26 in 1 : vector<8x8xf32>, vector<8x1xf32> -> vector<8x9xf32>
    %c0_22 = arith.constant 0 : index
    %c0_23 = arith.constant 0 : index
    %42 = vector.load %arg3[%c0_22, %c0_23] : memref<8x9xf32, #tpu.memory_space<vmem>>, vector<8x9xf32>
    tpu.vector_store %arg3[%c0_22, %c0_23], %41 {strides = array<i32>} : memref<8x9xf32, #tpu.memory_space<vmem>>, vector<8x9xf32>,
    return
  }
}

</mosaic_0001>

<bundles_post_ra>
// kernel: forward.1
= control target key start
LH: loop header
LB: loop body
LE: loop exit
PB: predicated region body
PF: predicated region fallthrough
CT: control target
= control target key end

     0   :  { %8 = vsyncpa [#allocation3], 0  ;;  %s310_s0 = inlined_call_operand.hbm [shape: f32[8,16], index: 0, kind: input, shape index: {}]   ;;  %s311_s1 = inlined_call_operand.hbm [shape: f32[3,32,32], index: 1, kind: input, shape index: {}]   ;;  %s312_s2 = inlined_call_operand.hbm [shape: f32[3,32], index: 2, kind: input, shape index: {}]   ;;  %s313_s3 = inlined_call_operand.vmem [shape: f32[8,9], index: 3, kind: output, shape index: {}]  }
   0x1   :  { %9 = vsyncpa [#allocation5], 0  ;;  %s25_s14 = sshll.u32 %s311_s1, 4  ;;  %s267_s15 = smov [#allocation4]   ;;  %s26_s14 = int_to_ptr.hbm [resolvable:$true] %s25_s14 }
   0x2   :  { %s27_s16 = sshll.u32 %s267_s15, 4  ;;  %s15_s19 = sshll.u32 %s310_s0, 4  ;;  %s28_s16 = int_to_ptr.vmem [resolvable:$true] %s27_s16  ;;  %s16_s19 = int_to_ptr.hbm [resolvable:$true] %s15_s19 }
   0x3   :  { %s268_s20 = smov 128   ;;  %s269_s21 = smov 8  }
   0x4   :  { %33 = dma.hbm_to_vmem [thread:$0]  %s26_s14, 1536, %s28_s16, [#allocation5], %s268_s20, %s268_s20, %s269_s21  }
   0x5   :  { %s270_s22 = smov [#allocation2]   ;;  %s39_s26 = sshll.u32 %s312_s2, 4  ;;  %s40_s26 = int_to_ptr.hbm [resolvable:$true] %s39_s26 }
   0x6   :  { %s17_s23 = sshll.u32 %s270_s22, 4  ;;  %s271_s1 = smov [#allocation6]   ;;  %s18_s23 = int_to_ptr.vmem [resolvable:$true] %s17_s23 }
   0x7   :  { %20 = dma.hbm_to_vmem [thread:$0]  %s16_s19, 128, %s18_s23, [#allocation3]  }
   0x8   :  { %s41_s27 = sshll.u32 %s271_s1, 4  ;;  %s42_s27 = int_to_ptr.vmem [resolvable:$true] %s41_s27 }
   0x9   :  { %44 = dma.hbm_to_vmem [thread:$0]  %s40_s26, 64, %s42_s27, [#allocation5]  }
   0xa   :  { %263 = dma.done.wait [#allocation3], 128  }
   0xb   :  { %264 = vsyncadd [#allocation3], 4294967168 }
   0xc   :  { %265 = dma.done.wait [#allocation5], 1600  }
   0xd   :  { %266 = vsyncadd [#allocation5], 4294965696  ;;  %v63_v0 = vld [vmem:[#allocation4 + $0x18] sm:$0xff]  ;;  %v62_v1 = vld [vmem:[#allocation4 + $0x10] sm:$0xff]  ;;  %vm58_vm0 = vcmask 130048   ;;  %vm78_vm1 = vcmask 261120  }
   0xe   :  { %94 = vmatpush.msra.mxu0 %v63_v0  ;;  %v68_v2 = vld [vmem:[#allocation4 + $0x38] sm:$0xff]  ;;  %v61_v3 = vld [vmem:[#allocation4 + $0x8] sm:$0xff]  ;;  %v60_v5 = vld [vmem:[#allocation4] sm:$0xff]  ;;  %vm152_vm2 = vcmask 64512   ;;  %vm168_vm3 = vcmask 72704  }
   0xf   :  { %v57_v4 = vld [vmem:[#allocation2] sm:$0xff]  ;;  %119 = vmatpush.msra.mxu1 %v68_v2  ;;  %v67_v7 = vld [vmem:[#allocation4 + $0x30] sm:$0xff]  ;;  %v66_v8 = vld [vmem:[#allocation4 + $0x28] sm:$0xff] }
  0x10   :  { %95 = vmatpush.msra.mxu0 %v62_v1  ;;  %v59_v6 = vsel %vm58_vm0, %v57_v4, 0.0  ;;  %v65_v9 = vld [vmem:[#allocation4 + $0x20] sm:$0xff]  ;;  %v73_v10 = vld [vmem:[#allocation4 + $0x58] sm:$0xff]  ;;  %v72_v15 = vld [vmem:[#allocation4 + $0x50] sm:$0xff] }
  0x11   :  { %120 = vmatpush.msra.mxu1 %v67_v7  ;;  %144 = vmatpush.msra.mxu2 %v73_v10  ;;  %v184_v11 = vld [vmem:[#allocation6] ss:$0 sm:$0xff]  ;;  %v71_v16 = vld [vmem:[#allocation4 + $0x48] sm:$0xff]  ;;  %v185_v18 = vld [vmem:[#allocation6 + $0x1] ss:$0 sm:$0xff] }
  0x12   :  { %96 = vmatpush.msra.mxu0 %v61_v3  ;;  %v70_v17 = vld [vmem:[#allocation4 + $0x40] sm:$0xff] }
  0x13   :  { %121 = vmatpush.msra.mxu1 %v66_v8  ;;  %145 = vmatpush.msra.mxu2 %v72_v15  ;;  %v186_v22 = vld [vmem:[#allocation6 + $0x2] ss:$0 sm:$0xff] }
  0x14   :  { %97 = vmatpush.msra.mxu0 %v60_v5 }
  0x15   :  { %176 = vmatmul.msk.f32.vlgmr.msra.gmra.mxu0 %vm78_vm1, %v59_v6  ;;  %122 = vmatpush.msra.mxu1 %v65_v9 }
  0x16   :  { %146 = vmatpush.msra.mxu2 %v71_v16 }
  0x18   :  { %147 = vmatpush.msra.mxu2 %v70_v17 }
  0x92   :  { %v99_v12 = vpop.f32.mrf.mxu0 }
  0x93   :  { %v100_v13 = vadd.f32 %v184_v11, %v99_v12 }
  0x95   :  { %v102_v14 = vmax.f32 %v100_v13, 0.0 }
  0x97   :  { %177 = vmatmul.msk.f32.vlgmr.msra.gmra.mxu1 %vm78_vm1, %v102_v14 }
 0x114   :  { %v124_v19 = vpop.f32.mrf.mxu1 }
 0x115   :  { %v125_v20 = vadd.f32 %v185_v18, %v124_v19 }
 0x117   :  { %v127_v21 = vmax.f32 %v125_v20, 0.0 }
 0x119   :  { %178 = vmatmul.msk.f32.vlgmr.msra.gmra.mxu2 %vm78_vm1, %v127_v21 }
 0x19c   :  { %v149_v23 = vpop.f32.mrf.mxu2 }
 0x19d   :  { %v150_v24 = vadd.f32 %v186_v22, %v149_v23 }
 0x19f   :  { %v153_v25 = vsel %vm152_vm2, %v150_v24, -inf }
 0x1a0   :  { %154 = vmax.xlane.f32.xlu0 %v153_v25 }
 0x213   :  { %v155_v26 = vpop.xlane.xlu0 %154 }
 0x214   :  { %v156_v27 = vsub.f32 %v150_v24, %v155_v26 }
 0x216   :  { %v157_v28 = vmul.f32 1.442695, %v156_v27 }
 0x218   :  { %187 = vpow2.f32 %v157_v28 }
 0x21e   :  { %v188_v29 = vpop.eup %187 }
 0x21f   :  { %v159_v30 = vsel %vm152_vm2, %v188_v29, 0.0 }
 0x220   :  { %160 = vadd.xlane.f32.xlu0 %v159_v30 }
 0x293   :  { %v161_v31 = vpop.xlane.xlu0 %160 }
 0x294   :  { %189 = vrcp.f32 %v161_v31 }
 0x29a   :  { %v190_v32 = vpop.eup %189 }
 0x29b   :  { %v163_v33 = vmul.f32 %v190_v32, %v161_v31 }
 0x29d   :  { %v164_v34 = vsub.f32 2.0, %v163_v33 }
 0x29f   :  { %v165_v35 = vmul.f32 %v190_v32, %v164_v34 }
 0x2a1   :  { %v166_v36 = vmul.f32 %v188_v29, %v165_v35 }
 0x2a3   :  { %v167_v37 = vsel %vm152_vm2, %v166_v36, %v150_v24 }
 0x2a4   :  { %169 = vst.msk [vmem:[%s313_s3] sm:$0xff] %vm168_vm3, %v167_v37 }
 0x2a5   :  { %174 = vsyncpa [#allocation3], 1 }
 0x2a6   :  { %175 = vsyncpa [#allocation5], 1 }

</bundles_post_ra>
